<compile_context>
chip_gen: v7x
topology: tpu7x:2x2x1
jax: 0.10.0
libtpu: 0.0.40
codegen_flags: <defaults>
</compile_context>

<pallas_src>
import jax
import jax.numpy as jnp
from jax import lax
from jax.experimental import pallas as pl
from jax.experimental.pallas import tpu as pltpu


def _round_up(x: int, m: int) -> int:
    return ((x + m - 1) // m) * m


def _cdiv(a: int, b: int) -> int:
    return (a + b - 1) // b


def _nbytes(x) -> int:
    return int(x.size) * x.dtype.itemsize


def _choose_tiling(B: int, block_b: int):
    """Pick (tile_rows, num_tiles).

    Small batches -> one full tile (rounded to 16 rows for clean bf16 sublane packing).
    Larger batches -> >= 2 tiles (so both v7x TensorCores get work), tile rows a multiple
    of 128 (lane-dense output blocks), chosen to minimize padding, tie-broken toward
    fewer grid steps (per-step overhead ~0.35 us).
    """
    block_b = max(128, _round_up(block_b, 128))
    if B < 256:
        return max(16, _round_up(B, 16)), 1
    best_key, best = None, None
    for tb in range(128, block_b + 1, 128):
        n = max(2, _cdiv(B, tb))
        key = (n * tb - B, n)          # (padding rows, grid steps)
        if best_key is None or key < best_key:
            best_key, best = key, (tb, n)
    return best


def _qnet_kernel(s_ref, a_ref, w1s_ref, w1a_ref, b1_ref, w2_ref, b2_ref,
                 w3_ref, b3_ref, o_ref):
    # ---- Layer 1 (concat fused): x @ W1 == state @ W1[:S] + action @ W1[S:] ----
    h1 = (
        jnp.dot(s_ref[...], w1s_ref[...], preferred_element_type=jnp.float32)
        + jnp.dot(a_ref[...], w1a_ref[...], preferred_element_type=jnp.float32)
        + b1_ref[...]                      # (1, H) broadcasts over rows, f32
    )
    h1 = jnp.maximum(h1, 0.0)              # ReLU; Dropout(0.2) == identity (eval mode)

    # ---- Layer 2 ----
    # Cast the activation back to the weight dtype so a bf16 weight path keeps the MXU
    # in bf16 (no-op when everything is f32). Accumulation stays f32.
    h2 = (
        jnp.dot(h1.astype(w2_ref.dtype), w2_ref[...],
                preferred_element_type=jnp.float32)
        + b2_ref[...]
    )
    h2 = jnp.maximum(h2, 0.0)              # (TB, H) f32

    # ---- Layer 3 (out_features == 1), lane-dense ----
    # (1, H) x (TB, H) contracted on H -> (1, TB): same NT dot_general pattern as
    # flash-attention's q @ k^T; output row is lane-dense so the store is unmasked.
    q_row = lax.dot_general(
        w3_ref[...].astype(jnp.float32), h2,
        dimension_numbers=(((1,), (1,)), ((), ())),
        preferred_element_type=jnp.float32,
    )                                      # (1, TB)
    o_ref[...] = q_row + b3_ref[...]       # (1, 1) broadcasts; f32 output


def qnetwork_forward(state, action, params, *, block_b: int = 1024,
                     compute_dtype=jnp.bfloat16):
    """Pallas-backed forward pass of QNetwork. Returns (B, 1) f32 Q-values.

    compute_dtype affects matmul operands only (bf16 default for HBM-byte/MXU reasons);
    accumulation, biases, ReLU and the output are always f32.
    """
    w1, b1, w2, b2, w3, b3 = params
    B, S = state.shape
    A = action.shape[1]
    H = w1.shape[1]

    # Matmul operands in compute_dtype.
    state = state.astype(compute_dtype)
    action = action.astype(compute_dtype)
    w1_s = w1[:S].astype(compute_dtype)    # split W1 to fuse the concat into the kernel
    w1_a = w1[S:].astype(compute_dtype)
    w2_c = w2.astype(compute_dtype)
    w3_row = w3.reshape(1, H).astype(compute_dtype)
    # Biases / epilogue stay f32.
    b1_f = b1.reshape(1, H).astype(jnp.float32)
    b2_f = b2.reshape(1, H).astype(jnp.float32)
    b3_f = b3.reshape(1, 1).astype(jnp.float32)

    TB, n_tiles = _choose_tiling(B, block_b)
    B_pad = TB * n_tiles
    if B_pad != B:
        pad = B_pad - B
        state = jnp.pad(state, ((0, pad), (0, 0)))
        action = jnp.pad(action, ((0, pad), (0, 0)))
        # NOTE: padded rows produce garbage q values; they are sliced off below.

    cost = pl.CostEstimate(
        flops=2 * B_pad * H * (S + A + H + 1),
        transcendentals=0,
        bytes_accessed=(
            _nbytes(state) + _nbytes(action)
            + _nbytes(w1_s) + _nbytes(w1_a) + _nbytes(w2_c) + _nbytes(w3_row)
            + _nbytes(b1_f) + _nbytes(b2_f) + _nbytes(b3_f)
            + B_pad * 4
        ),
    )

    out = pl.pallas_call(
        _qnet_kernel,
        out_shape=jax.ShapeDtypeStruct((1, B_pad), jnp.float32),
        grid=(n_tiles,),
        in_specs=[
            pl.BlockSpec((TB, S), lambda i: (i, 0)),   # state tile
            pl.BlockSpec((TB, A), lambda i: (i, 0)),   # action tile
            pl.BlockSpec((S, H), lambda i: (0, 0)),    # W1[:S]   (VMEM-resident)
            pl.BlockSpec((A, H), lambda i: (0, 0)),    # W1[S:]   (VMEM-resident)
            pl.BlockSpec((1, H), lambda i: (0, 0)),    # b1
            pl.BlockSpec((H, H), lambda i: (0, 0)),    # W2       (VMEM-resident)
            pl.BlockSpec((1, H), lambda i: (0, 0)),    # b2
            pl.BlockSpec((1, H), lambda i: (0, 0)),    # W3 as a row
            pl.BlockSpec((1, 1), lambda i: (0, 0)),    # b3
        ],
        out_specs=pl.BlockSpec((1, TB), lambda i: (0, i)),   # lane-dense output row
        compiler_params=pltpu.CompilerParams(
            dimension_semantics=("parallel",),         # batch tiles -> megacore on v7x
        ),
        cost_estimate=cost,
    )(state, action, w1_s, w1_a, b1_f, w2_c, b2_f, w3_row, b3_f)

    return out[0, :B].reshape(B, 1)


def init_params(key, state_dim, action_dim, hidden_dim):
    """Deterministic init matching the PyTorch module: xavier_uniform_ weights, bias=0.01."""
    d_in = state_dim + action_dim

    def xavier_uniform(k, fan_in, fan_out):
        bound = jnp.sqrt(6.0 / (fan_in + fan_out))
        # stored as (in, out) so the kernel computes x @ W (== PyTorch x @ W.T)
        return jax.random.uniform(
            k, (fan_in, fan_out), dtype=jnp.float32, minval=-bound, maxval=bound
        )

    k1, k2, k3 = jax.random.split(key, 3)
    w1 = xavier_uniform(k1, d_in, hidden_dim)
    b1 = jnp.full((1, hidden_dim), 0.01, dtype=jnp.float32)
    w2 = xavier_uniform(k2, hidden_dim, hidden_dim)
    b2 = jnp.full((1, hidden_dim), 0.01, dtype=jnp.float32)
    w3 = xavier_uniform(k3, hidden_dim, 1)
    b3 = jnp.full((1, 1), 0.01, dtype=jnp.float32)
    return (w1, b1, w2, b2, w3, b3)


def qnetwork_ref(state, action, params):
    """Pure-JAX reference for correctness checking."""
    w1, b1, w2, b2, w3, b3 = params
    x = jnp.concatenate([state, action], axis=1)
    h1 = jnp.maximum(x @ w1 + b1, 0.0)
    h2 = jnp.maximum(h1 @ w2 + b2, 0.0)
    return h2 @ w3 + b3


if __name__ == "__main__":
    STATE_DIM, ACTION_DIM, HIDDEN = 24, 8, 32

    key = jax.random.PRNGKey(0)
    k_s, k_a, k_p = jax.random.split(key, 3)
    params = init_params(k_p, STATE_DIM, ACTION_DIM, HIDDEN)

    # --- small batch: single-tile path, strict f32 correctness ---
    B = 8
    state = jax.random.normal(k_s, (B, STATE_DIM), dtype=jnp.float32)
    action = jax.random.normal(k_a, (B, ACTION_DIM), dtype=jnp.float32)

    out = qnetwork_forward(state, action, params, compute_dtype=jnp.float32)
    out = jax.block_until_ready(out)
    ref = qnetwork_ref(state, action, params)
    assert out.shape == (B, 1), out.shape
    assert jnp.allclose(out, ref, atol=1e-5, rtol=1e-5), (
        f"small-batch f32 max abs err = {jnp.max(jnp.abs(out - ref))}"
    )

    # --- larger batch: multi-tile, lane-dense output path ---
    B2 = 1000
    k_s2, k_a2 = jax.random.split(jax.random.PRNGKey(1))
    state2 = jax.random.normal(k_s2, (B2, STATE_DIM), dtype=jnp.float32)
    action2 = jax.random.normal(k_a2, (B2, ACTION_DIM), dtype=jnp.float32)
    ref2 = qnetwork_ref(state2, action2, params)

    # f32 path (strict)
    out2_f32 = qnetwork_forward(state2, action2, params, compute_dtype=jnp.float32)
    out2_f32 = jax.block_until_ready(out2_f32)
    assert out2_f32.shape == (B2, 1), out2_f32.shape
    assert jnp.allclose(out2_f32, ref2, atol=1e-4, rtol=1e-4), (
        f"large-batch f32 max abs err = {jnp.max(jnp.abs(out2_f32 - ref2))}"
    )

    # bf16 production default (loose tolerance vs f32 reference)
    out2_bf16 = qnetwork_forward(state2, action2, params)
    out2_bf16 = jax.block_until_ready(out2_bf16)
    assert out2_bf16.shape == (B2, 1), out2_bf16.shape
    assert jnp.allclose(out2_bf16, ref2, atol=1e-1, rtol=1e-1), (
        f"large-batch bf16 max abs err = {jnp.max(jnp.abs(out2_bf16 - ref2))}"
    )

    print("KERNEL_OK")
</pallas_src>

<mosaic_0001>
module attributes {stable_mosaic.version = 11 : i64} {
  func.func @_qnet_kernel(%arg0: i32, %arg1: memref<16x24xf32, #tpu.memory_space<vmem>>, %arg2: memref<16x8xf32, #tpu.memory_space<vmem>>, %arg3: memref<24x32xf32, #tpu.memory_space<vmem>>, %arg4: memref<8x32xf32, #tpu.memory_space<vmem>>, %arg5: memref<1x32xf32, #tpu.memory_space<vmem>>, %arg6: memref<32x32xf32, #tpu.memory_space<vmem>>, %arg7: memref<1x32xf32, #tpu.memory_space<vmem>>, %arg8: memref<1x32xf32, #tpu.memory_space<vmem>>, %arg9: memref<1x1xf32, #tpu.memory_space<vmem>>, %arg10: memref<1x16xf32, #tpu.memory_space<vmem>>) attributes {dimension_semantics = [#tpu.dimension_semantics<parallel>], iteration_bounds = array<i64: 1>, scalar_prefetch = 0 : i64, scratch_operands = 0 : i64, tpu.core_type = #tpu.core_type<tc>, window_params = [{transform_indices = @transform_0, window_bounds = array<i64: 16, 24>}, {transform_indices = @transform_1, window_bounds = array<i64: 16, 8>}, {pipeline_mode = #tpu.pipeline_mode<synchronous>, transform_indices = @transform_2, window_bounds = array<i64: 24, 32>}, {pipeline_mode = #tpu.pipeline_mode<synchronous>, transform_indices = @transform_3, window_bounds = array<i64: 8, 32>}, {pipeline_mode = #tpu.pipeline_mode<synchronous>, transform_indices = @transform_4, window_bounds = array<i64: 1, 32>}, {pipeline_mode = #tpu.pipeline_mode<synchronous>, transform_indices = @transform_5, window_bounds = array<i64: 32, 32>}, {pipeline_mode = #tpu.pipeline_mode<synchronous>, transform_indices = @transform_6, window_bounds = array<i64: 1, 32>}, {pipeline_mode = #tpu.pipeline_mode<synchronous>, transform_indices = @transform_7, window_bounds = array<i64: 1, 32>}, {pipeline_mode = #tpu.pipeline_mode<synchronous>, transform_indices = @transform_8, window_bounds = array<i64: 1, 1>}, {transform_indices = @transform_9, window_bounds = array<i64: 1, 16>}]} {
    %c0 = arith.constant 0 : index
    %c0_0 = arith.constant 0 : index
    %0 = vector.load %arg1[%c0, %c0_0] : memref<16x24xf32, #tpu.memory_space<vmem>>, vector<16x24xf32>
    %c0_1 = arith.constant 0 : index
    %c0_2 = arith.constant 0 : index
    %1 = vector.load %arg3[%c0_1, %c0_2] : memref<24x32xf32, #tpu.memory_space<vmem>>, vector<24x32xf32>
    %cst = arith.constant dense<0.000000e+00> : vector<16x32xf32>
    %2 = tpu.matmul %0, %1, %cst {dimension_numbers = #tpu.dot_dimension_numbers<[1], [0], [0], [1], [0, 0, 1, 1], [], []>} : vector<16x24xf32>, vector<24x32xf32>, vector<16x32xf32> -> vector<16x32xf32>
    %c0_3 = arith.constant 0 : index
    %c0_4 = arith.constant 0 : index
    %3 = vector.load %arg2[%c0_3, %c0_4] : memref<16x8xf32, #tpu.memory_space<vmem>>, vector<16x8xf32>
    %c0_5 = arith.constant 0 : index
    %c0_6 = arith.constant 0 : index
    %4 = vector.load %arg4[%c0_5, %c0_6] : memref<8x32xf32, #tpu.memory_space<vmem>>, vector<8x32xf32>
    %cst_7 = arith.constant dense<0.000000e+00> : vector<16x32xf32>
    %5 = tpu.matmul %3, %4, %cst_7 {dimension_numbers = #tpu.dot_dimension_numbers<[1], [0], [0], [1], [0, 0, 1, 1], [], []>} : vector<16x8xf32>, vector<8x32xf32>, vector<16x32xf32> -> vector<16x32xf32>
    %6 = arith.addf %2, %5 : vector<16x32xf32>
    %c0_8 = arith.constant 0 : index
    %c0_9 = arith.constant 0 : index
    %7 = vector.load %arg5[%c0_8, %c0_9] : memref<1x32xf32, #tpu.memory_space<vmem>>, vector<1x32xf32>
    %8 = vector.broadcast %7 : vector<1x32xf32> to vector<16x32xf32>
    %9 = arith.addf %6, %8 : vector<16x32xf32>
    %cst_10 = arith.constant 0.000000e+00 : f32
    %10 = vector.broadcast %cst_10 : f32 to vector<16x32xf32>
    %11 = arith.maximumf %9, %10 : vector<16x32xf32>
    %c0_11 = arith.constant 0 : index
    %c0_12 = arith.constant 0 : index
    %12 = vector.load %arg6[%c0_11, %c0_12] : memref<32x32xf32, #tpu.memory_space<vmem>>, vector<32x32xf32>
    %cst_13 = arith.constant dense<0.000000e+00> : vector<16x32xf32>
    %13 = tpu.matmul %11, %12, %cst_13 {dimension_numbers = #tpu.dot_dimension_numbers<[1], [0], [0], [1], [0, 0, 1, 1], [], []>} : vector<16x32xf32>, vector<32x32xf32>, vector<16x32xf32> -> vector<16x32xf32>
    %c0_14 = arith.constant 0 : index
    %c0_15 = arith.constant 0 : index
    %14 = vector.load %arg7[%c0_14, %c0_15] : memref<1x32xf32, #tpu.memory_space<vmem>>, vector<1x32xf32>
    %15 = vector.broadcast %14 : vector<1x32xf32> to vector<16x32xf32>
    %16 = arith.addf %13, %15 : vector<16x32xf32>
    %cst_16 = arith.constant 0.000000e+00 : f32
    %17 = vector.broadcast %cst_16 : f32 to vector<16x32xf32>
    %18 = arith.maximumf %16, %17 : vector<16x32xf32>
    %c0_17 = arith.constant 0 : index
    %c0_18 = arith.constant 0 : index
    %19 = vector.load %arg8[%c0_17, %c0_18] : memref<1x32xf32, #tpu.memory_space<vmem>>, vector<1x32xf32>
    %cst_19 = arith.constant dense<0.000000e+00> : vector<1x16xf32>
    %20 = tpu.matmul %19, %18, %cst_19 {dimension_numbers = #tpu.dot_dimension_numbers<[1], [1], [0], [0], [0, 0, 1, 0], [], []>} : vector<1x32xf32>, vector<16x32xf32>, vector<1x16xf32> -> vector<1x16xf32>
    %c0_20 = arith.constant 0 : index
    %c0_21 = arith.constant 0 : index
    %21 = vector.load %arg9[%c0_20, %c0_21] : memref<1x1xf32, #tpu.memory_space<vmem>>, vector<1x1xf32>
    %22 = vector.broadcast %21 : vector<1x1xf32> to vector<1x16xf32>
    %23 = arith.addf %20, %22 : vector<1x16xf32>
    %c0_22 = arith.constant 0 : index
    %c0_23 = arith.constant 0 : index
    %24 = vector.load %arg10[%c0_22, %c0_23] : memref<1x16xf32, #tpu.memory_space<vmem>>, vector<1x16xf32>
    tpu.vector_store %arg10[%c0_22, %c0_23], %23 {strides = array<i32>} : memref<1x16xf32, #tpu.memory_space<vmem>>, vector<1x16xf32>,
    return
  }
  func.func @transform_0(%arg0: i32) -> (i32, i32) {
    %c0_i32 = arith.constant 0 : i32
    %c0_i32_0 = arith.constant 0 : i32
    return %arg0, %c0_i32 : i32, i32
  }
  func.func @transform_1(%arg0: i32) -> (i32, i32) {
    %c0_i32 = arith.constant 0 : i32
    %c0_i32_0 = arith.constant 0 : i32
    return %arg0, %c0_i32 : i32, i32
  }
  func.func @transform_2(%arg0: i32) -> (i32, i32) {
    %c0_i32 = arith.constant 0 : i32
    %c0_i32_0 = arith.constant 0 : i32
    %c0_i32_1 = arith.constant 0 : i32
    return %c0_i32, %c0_i32_0 : i32, i32
  }
  func.func @transform_3(%arg0: i32) -> (i32, i32) {
    %c0_i32 = arith.constant 0 : i32
    %c0_i32_0 = arith.constant 0 : i32
    %c0_i32_1 = arith.constant 0 : i32
    return %c0_i32, %c0_i32_0 : i32, i32
  }
  func.func @transform_4(%arg0: i32) -> (i32, i32) {
    %c0_i32 = arith.constant 0 : i32
    %c0_i32_0 = arith.constant 0 : i32
    %c0_i32_1 = arith.constant 0 : i32
    return %c0_i32, %c0_i32_0 : i32, i32
  }
  func.func @transform_5(%arg0: i32) -> (i32, i32) {
    %c0_i32 = arith.constant 0 : i32
    %c0_i32_0 = arith.constant 0 : i32
    %c0_i32_1 = arith.constant 0 : i32
    return %c0_i32, %c0_i32_0 : i32, i32
  }
  func.func @transform_6(%arg0: i32) -> (i32, i32) {
    %c0_i32 = arith.constant 0 : i32
    %c0_i32_0 = arith.constant 0 : i32
    %c0_i32_1 = arith.constant 0 : i32
    return %c0_i32, %c0_i32_0 : i32, i32
  }
  func.func @transform_7(%arg0: i32) -> (i32, i32) {
    %c0_i32 = arith.constant 0 : i32
    %c0_i32_0 = arith.constant 0 : i32
    %c0_i32_1 = arith.constant 0 : i32
    return %c0_i32, %c0_i32_0 : i32, i32
  }
  func.func @transform_8(%arg0: i32) -> (i32, i32) {
    %c0_i32 = arith.constant 0 : i32
    %c0_i32_0 = arith.constant 0 : i32
    %c0_i32_1 = arith.constant 0 : i32
    return %c0_i32, %c0_i32_0 : i32, i32
  }
  func.func @transform_9(%arg0: i32) -> (i32, i32) {
    %c0_i32 = arith.constant 0 : i32
    %c0_i32_0 = arith.constant 0 : i32
    return %c0_i32, %arg0 : i32, i32
  }
}

</mosaic_0001>

<bundles_post_ra>
// kernel: tpu_custom_call.1
= control target key start
LH: loop header
LB: loop body
LE: loop exit
PB: predicated region body
PF: predicated region fallthrough
CT: control target
= control target key end

     0   :  { %s742_s0 = inlined_call_operand.hbm [shape: f32[16,24], index: 0, kind: input, shape index: {}]   ;;  %s743_s1 = inlined_call_operand.vmem [shape: f32[16,8], index: 1, kind: input, shape index: {}]   ;;  %s744_s2 = inlined_call_operand.hbm [shape: f32[24,32], index: 2, kind: input, shape index: {}]   ;;  %s745_s3 = inlined_call_operand.vmem [shape: f32[8,32], index: 3, kind: input, shape index: {}]   ;;  %s746_s4 = inlined_call_operand.vmem [shape: f32[1,32], index: 4, kind: input, shape index: {}]   ;;  %s747_s5 = inlined_call_operand.vmem [shape: f32[32,32], index: 5, kind: input, shape index: {}]   ;;  %s748_s6 = inlined_call_operand.vmem [shape: f32[1,32], index: 6, kind: input, shape index: {}]   ;;  %s749_s7 = inlined_call_operand.vmem [shape: f32[1,32], index: 7, kind: input, shape index: {}]   ;;  %s750_s8 = inlined_call_operand.<no memory space> [shape: f32[1,1], index: 8, kind: input, shape index: {}]   ;;  %s751_s9 = inlined_call_operand.hbm [shape: f32[1,16], index: 9, kind: output, shape index: {}]  }
   0x1   :  { %v14_v0 = vstv %s750_s8 }
   0x2   :  { %15 = vst [vmem:[#allocation2] sm:$0x1] %v14_v0 }
   0x3   :  { %16 = vsyncpa [#allocation4], 0 }
   0x4   :  { %17 = vsyncpa [#allocation7], 0 }
   0x5   :  { %18 = vsyncpa [#allocation5], 0  ;;  %s609_s11 = smov [#allocation3]   ;;  %s537_s15 = scalar_lea.hbm %s742_s0, 256 }
   0x6   :  { %s24_s12 = sshll.u32 %s609_s11, 4  ;;  %p538_p0 = scmp.ne.s32.totalorder %s742_s0, %s537_s15  ;;  %s25_s12 = int_to_ptr.vmem [resolvable:$true] %s24_s12 }
   0x7   :  { %p541_p1 = scmp.lt.u32.totalorder %s537_s15, %s742_s0 }
   0x9   :  { %p543_p2 = pnand %p541_p1, %p538_p0 }
   0xb   :  { %546 = shalt.err (!%p543_p2)
}
   0xc   :  { %s547_s8 = scalar_lea.vmem %s25_s12, 256  ;;  %p552_p4 = scmp.lt.s32.totalorder %s25_s12, %s25_s12 }
   0xd   :  { %p548_p3 = scmp.ne.s32.totalorder %s25_s12, %s547_s8  ;;  %p553_p5 = scmp.lt.s32.totalorder %s547_s8, %s547_s8 }
   0xf   :  { %p554_p6 = por %p553_p5, %p552_p4 }
  0x11   :  { %p555_p7 = pnand %p554_p6, %p548_p3 }
  0x13   :  { %558 = shalt.err (!%p555_p7)
}
  0x14   :  { %s610_s20 = smov 128   ;;  %s611_s21 = smov 8  }
  0x15   :  { %30 = dma.hbm_to_vmem [thread:$0]  %s742_s0, 256, %s25_s12, [#allocation4], %s610_s20, %s610_s20, %s611_s21  }
  0x16   :  { %s612_s24 = smov [#allocation6]   ;;  %s559_s28 = scalar_lea.hbm %s744_s2, 384 }
  0x17   :  { %s38_s25 = sshll.u32 %s612_s24, 4  ;;  %p560_p8 = scmp.ne.s32.totalorder %s744_s2, %s559_s28  ;;  %s39_s25 = int_to_ptr.vmem [resolvable:$true] %s38_s25 }
  0x18   :  { %p563_p9 = scmp.lt.u32.totalorder %s559_s28, %s744_s2 }
  0x1a   :  { %p565_p10 = pnand %p563_p9, %p560_p8 }
  0x1c   :  { %568 = shalt.err (!%p565_p10)
}
  0x1d   :  { %s569_s13 = scalar_lea.vmem %s39_s25, 384  ;;  %p574_p12 = scmp.lt.s32.totalorder %s39_s25, %s39_s25 }
  0x1e   :  { %p570_p11 = scmp.ne.s32.totalorder %s39_s25, %s569_s13  ;;  %p575_p13 = scmp.lt.s32.totalorder %s569_s13, %s569_s13 }
  0x20   :  { %p576_p0 = por %p575_p13, %p574_p12 }
  0x22   :  { %p577_p1 = pnand %p576_p0, %p570_p11 }
  0x24   :  { %580 = shalt.err (!%p577_p1)
}
  0x25   :  { %44 = dma.hbm_to_vmem [thread:$0]  %s744_s2, 384, %s39_s25, [#allocation7], %s610_s20, %s610_s20, %s611_s21  }
  0x26   :  { %603 = dma.done.wait [#allocation4], 256  }
  0x27   :  { %604 = vsyncadd [#allocation4], 4294967040 }
  0x28   :  { %605 = dma.done.wait [#allocation7], 384  }
  0x29   :  { %606 = vsyncadd [#allocation7], 4294966912  ;;  %vm71_vm0 = vcmask 64512   ;;  %v65_v1 = vld [vmem:[#allocation6] sm:$0xff]  ;;  %v66_v2 = vld [vmem:[#allocation6 + $0x8] sm:$0xff]  ;;  %vm153_vm1 = vcmask 195584   ;;  %v348_v40 = vlaneseq }
  0x2a   :  { %v70_v3 = vld [vmem:[%s745_s3] sm:$0xff]  ;;  %v509_v4 = vpack.c.bf16 %v66_v2, %v65_v1  ;;  %v69_v6 = vld [vmem:[%s743_s1 + $0x8] sm:$0xff]  ;;  %v248_v13 = vld [vmem:[%s747_s5 + $0x10] sm:$0xff]  ;;  %vm257_vm2 = vcmask 261120   ;;  %v613_v27 = vmov 0.0|0.0   ;;  %vm614_vm3 = vmmov 0  }
  0x2b   :  { %477 = vmatprep.subr.mxu1 %v70_v3  ;;  %v68_v5 = vld [vmem:[%s743_s1] sm:$0xff]  ;;  %v64_v9 = vld [vmem:[#allocation3 + $0x8] sm:$0xff]  ;;  %v249_v14 = vld [vmem:[%s747_s5 + $0x18] sm:$0xff]  ;;  %v615_v28 = vmov 0.0   ;;  %v616_v30 = vmov 0   ;;  %v349_v41 = vshrl.u32 %v348_v40, 7 }
  0x2c   :  { %478 = vmatpush3.msra.mxu1 %v70_v3  ;;  %479 = vmatprep.mubr.msk.f32.mxu1 %vm71_vm0, %v68_v5  ;;  %v67_v7 = vld [vmem:[#allocation6 + $0x10] sm:$0xff]  ;;  %v517_v15 = vpack.c.bf16 %v249_v14, %v248_v13  ;;  %v453_v19 = vld [vmem:[%s746_s4] ss:$0 sm:$0xff]  ;;  %vm523_vm4 = vmpackc.low %vm257_vm2, %vm257_vm2  ;;  %vm431_vm5 = vcmask 122880  }
  0x2d   :  { %v63_v8 = vld [vmem:[#allocation3] sm:$0xff]  ;;  %510 = vmatprep.subr.bf16.mxu0 %v509_v4  ;;  %480 = vmatmul.mubr.msk.f32.vlgmr.msra.gmra.mrb[0].mxu1 %vm71_vm0, %v69_v6  ;;  %v342_v29 = vld [vmem:[#allocation2] sm:$0x1]  ;;  %v350_v42 = vsub.s32 0, %v349_v41 }
  0x2e   :  { %512 = vmatpush3.bf16.msra.mxu0 %v509_v4  ;;  %488 = vmatprep.mubr.msk.f32.mxu0 %vm153_vm1, %v63_v8  ;;  %v246_v10 = vld [vmem:[%s747_s5] sm:$0xff]  ;;  %v247_v11 = vld [vmem:[%s747_s5 + $0x8] sm:$0xff] }
  0x2f   :  { %486 = vmatprep.subr.mxu0 %v67_v7  ;;  %v513_v12 = vpack.c.bf16 %v247_v11, %v246_v10  ;;  %536 = vset.pattern.permute.xlu0 %v616_v30  ;;  %v454_v31 = vld [vmem:[%s748_s6] ss:$0 sm:$0xff]  ;;  %s617_s6 = smov [#allocation8]  }
  0x30   :  { %345 = vperm.xlu0 %536, %v342_v29   ;;  %v341_v39 = vld [vmem:[%s749_s7] sm:$0x1]  ;;  %s439_s28 = sshll.u32 %s617_s6, 4  ;;  %s440_s28 = int_to_ptr.vmem [resolvable:$true] %s439_s28 }
  0x31   :  { %514 = vmatprep.subr.bf16.mxu1 %v513_v12  ;;  %s581_s29 = scalar_lea.vmem %s440_s28, 16  ;;  %s585_s30 = scalar_lea.vmem %s440_s28, 32 }
  0x32   :  { %487 = vmatpush3.msra.mxu0 %v67_v7  ;;  %516 = vmatpush3.bf16.msra.mxu1 %v513_v12  ;;  %p582_p2 = scmp.ne.s32.totalorder %s440_s28, %s581_s29  ;;  %p586_p3 = scmp.lt.s32.totalorder %s440_s28, %s440_s28 }
  0x33   :  { %489 = vmatmul.mubr.msk.f32.vlgmr.msra.gmra.mrb[0].mxu0 %vm153_vm1, %v64_v9  ;;  %518 = vmatprep.subr.bf16.mxu1 %v517_v15  ;;  %p587_p4 = scmp.lt.s32.totalorder %s585_s30, %s581_s29 }
  0x34   :  { %521 = vmatprep.subr.bf16.mxu0 %v613_v27  ;;  %506 = vmatprep.mubr.msk.f32.mxu0 %vm614_vm3, %v615_v28 }
  0x35   :  { %p588_p5 = por %p587_p4, %p586_p3 }
  0x36   :  { %520 = vmatpush3.bf16.msra.mxu1 %v517_v15 }
  0x37   :  { %p589_p6 = pnand %p588_p5, %p582_p2 }
  0xaf   :  { %v346_v43 = vpop.permute.xlu0 %345 }
  0xb0   :  { %v351_v44 = vrot.slane %v346_v43, %v350_v42 }
 0x100   :  { %v481_v16 = vpop.f32.mrb[0].mxu1 }
 0x101   :  { %v144_v17 = vpop.f32.mrb[1].mxu1 }
 0x106   :  { %v490_v18 = vpop.f32.mrb[0].mxu0 }
 0x107   :  { %v232_v20 = vadd.f32 %v490_v18, %v481_v16  ;;  %v226_v21 = vpop.f32.mrb[1].mxu0 }
 0x108   :  { %v227_v22 = vadd.f32 %v226_v21, %v144_v17 }
 0x109   :  { %v243_v23 = vadd.f32 %v453_v19, %v232_v20 }
 0x10a   :  { %v242_v24 = vadd.f32 %v453_v19, %v227_v22 }
 0x10b   :  { %v245_v26 = vmax.f32 %v243_v23, 0.0 }
 0x10c   :  { %v244_v25 = vmax.f32 %v242_v24, 0.0 }
 0x10e   :  { %499 = vmatprep.mubr.msk.f32.mxu1 %vm257_vm2, %v244_v25 }
 0x10f   :  { %500 = vmatmul.mubr.msk.f32.vlgmr.msra.gmra.mrb[2].mxu1 %vm257_vm2, %v245_v26 }
 0x1e2   :  { %v501_v32 = vpop.f32.mrb[2].mxu1 }
 0x1e3   :  { %v336_v33 = vadd.f32 %v501_v32, %v454_v31  ;;  %v330_v34 = vpop.f32.mrb[3].mxu1 }
 0x1e4   :  { %v331_v35 = vadd.f32 %v454_v31, %v330_v34 }
 0x1e5   :  { %v340_v36 = vmax.f32 %v336_v33, 0.0 }
 0x1e6   :  { %v339_v37 = vmax.f32 %v331_v35, 0.0 }
 0x1e8   :  { %v522_v38 = vpack.c.bf16 %v340_v36, %v339_v37 }
 0x1ea   :  { %524 = vmatpush3.bf16.xpose.msk.msra.mxu0 %vm523_vm4, %v522_v38 }
 0x1f1   :  { %507 = vmatmul.mubr.msk.f32.vlgmr.msra.gmra.mrb[2].mxu0 %vm257_vm2, %v341_v39 }
 0x2c4   :  { %v427_v45 = vpop.f32.mrb[2].mxu0 }
 0x2c5   :  { %v428_v46 = vadd.f32 %v427_v45, %v351_v44  ;;  %v508_v47 = vpop.f32.mrb[3].mxu0 }
 0x2c7   :  { %432 = vst.msk [vmem:[#allocation8] sm:$0x1] %vm431_vm5, %v428_v46 }
 0x2c8   :  { %592 = shalt.err (!%p589_p6)
}
 0x2c9   :  { %s593_s11 = scalar_lea.hbm %s751_s9, 16 }
 0x2ca   :  { %p594_p7 = scmp.ne.s32.totalorder %s751_s9, %s593_s11  ;;  %p597_p8 = scmp.lt.u32.totalorder %s593_s11, %s751_s9 }
 0x2cc   :  { %p599_p9 = pnand %p597_p8, %p594_p7 }
 0x2ce   :  { %602 = shalt.err (!%p599_p9)
}
 0x2cf   :  { %442 = dma.vmem_to_hbm [thread:$0]  %s440_s28, 16, %s751_s9, [#allocation5]  }
 0x2d0   :  { %607 = dma.done.wait [#allocation5], 16  }
 0x2d1   :  { %608 = vsyncadd [#allocation5], 4294967280 }
 0x2d2   :  { %446 = vsyncpa [#allocation4], 1 }
 0x2d3   :  { %447 = vsyncpa [#allocation7], 1 }
 0x2d4   :  { %448 = vsyncpa [#allocation5], 1 }

</bundles_post_ra>
